<compile_context>
chip_gen: v7x
topology: tpu7x:2x2x1
jax: 0.10.0
libtpu: 0.0.40
codegen_flags: <defaults>
</compile_context>

<pallas_src>
import functools

import jax
import jax.numpy as jnp
import numpy as np
from jax import lax
from jax.experimental import pallas as pl
from jax.experimental.pallas import tpu as pltpu


# ----------------------------------------------------------------------------
# Resident-path kernel (whole weight in VMEM)
# ----------------------------------------------------------------------------
def _spectral_norm_resident_kernel(w_ref, u_ref, v_ref, wout_ref, uout_ref, vout_ref,
                                   *, n_iters, eps):
    """Power iteration + sigma + weight * (1/sigma), fully VMEM resident.

    w_ref aliases wout_ref (input_output_aliases); all reads of w_ref happen before the final
    elementwise scale store, so in-place is safe.
    """
    wdt = w_ref.dtype
    u = u_ref[...].astype(jnp.float32)       # (1, h)
    v = v_ref[...].astype(jnp.float32)       # (1, w)

    eps2 = float(eps) * float(eps)
    inv_eps = 1.0 / float(eps)

    def _normalize(x):
        # torch.nn.functional.normalize: x / max(||x||, eps)  == x * rsqrt(||x||^2) (or x/eps)
        nsq = jnp.sum(x * x)
        inv = jnp.where(nsq >= eps2, lax.rsqrt(nsq), inv_eps)
        return x * inv

    def _Wv(vv):
        # (1,h) = v · W^T : contract the lane (w) dims (trans-B dot_general, no W.T formed).
        # W is consumed straight from its VMEM input buffer (no top-level binding).
        return lax.dot_general(vv.astype(wdt), w_ref[...], (((1,), (1,)), ((), ())),
                               preferred_element_type=jnp.float32)

    def _WTu(uu):
        # (1,w) = u · W : canonical form, no transpose of W.
        return lax.dot_general(uu.astype(wdt), w_ref[...], (((1,), (0,)), ((), ())),
                               preferred_element_type=jnp.float32)

    def _power_iter(uu, vv):
        uu = _normalize(_Wv(vv))
        wtu = _WTu(uu)
        vv = _normalize(wtu)
        return uu, vv, wtu

    if n_iters == 0:
        sigma = jnp.sum(u * _Wv(v))                               # u . (W v)
    else:
        if n_iters <= 2:
            wtu = jnp.zeros_like(v)
            for _ in range(n_iters):                              # unrolled (LLO visibility)
                u, v, wtu = _power_iter(u, v)
        else:
            u, v, wtu = lax.fori_loop(
                0, n_iters, lambda i, c: _power_iter(c[0], c[1]),
                (u, v, jnp.zeros_like(v)))
        # sigma = u . (W v) == v . (W^T u): reuse the last W^T u (saves a full W pass).
        sigma = jnp.sum(v * wtu)

    inv_sigma = 1.0 / sigma                                       # keep f32 (closer to torch /)
    wout_ref[...] = (w_ref[...] * inv_sigma).astype(wout_ref.dtype)
    uout_ref[...] = u.astype(uout_ref.dtype)
    vout_ref[...] = v.astype(vout_ref.dtype)


def _normalize_1d_kernel(x_ref, o_ref, *, eps):
    """ndim == 1 branch of forward(): F.normalize(weight, dim=0, eps)."""
    x = x_ref[...].astype(jnp.float32)                            # (1, n)
    nsq = jnp.sum(x * x)
    inv = jnp.where(nsq >= float(eps) * float(eps), lax.rsqrt(nsq), 1.0 / float(eps))
    o_ref[...] = (x * inv).astype(o_ref.dtype)


# ----------------------------------------------------------------------------
# Streaming-fallback kernels (grid over lane tiles of W)
# ----------------------------------------------------------------------------
def _wv_accum_kernel(w_ref, v_ref, o_ref, *, w_cols, tile_w):
    """Accumulate (1,h) += v_tile · W_tile^T across lane tiles (reduction grid axis)."""
    j = pl.program_id(0)

    @pl.when(j == 0)
    def _():
        o_ref[...] = jnp.zeros_like(o_ref)

    wt = w_ref[...]
    if w_cols % tile_w != 0:
        # Last tile is ragged: out-of-bounds columns of W are undefined on read -> mask them
        # (v's padding is exact zeros, but undefined*0 could be NaN).
        col = j * tile_w + lax.broadcasted_iota(jnp.int32, wt.shape, 1)
        wt = jnp.where(col < w_cols, wt, jnp.zeros_like(wt))
    vt = v_ref[...].astype(wt.dtype)
    o_ref[...] += lax.dot_general(vt, wt, (((1,), (1,)), ((), ())),
                                  preferred_element_type=jnp.float32)


def _wtu_kernel(w_ref, u_ref, o_ref):
    """Per-tile (1,tile_w) = u · W_tile ("parallel" grid axis)."""
    o_ref[...] = lax.dot_general(u_ref[...].astype(w_ref.dtype), w_ref[...],
                                 (((1,), (0,)), ((), ())),
                                 preferred_element_type=jnp.float32)


def _scale_kernel(inv_sig_ref, w_ref, o_ref):
    """Per-tile W * inv_sigma, lane-dense double-buffered writeback."""
    o_ref[...] = (w_ref[...] * inv_sig_ref[0, 0]).astype(o_ref.dtype)


# ----------------------------------------------------------------------------
# Wrappers
# ----------------------------------------------------------------------------
def _round_up(x, m):
    return ((x + m - 1) // m) * m


def _vmem_capacity_bytes():
    try:
        return int(pltpu.get_tpu_info().vmem_capacity_bytes)
    except Exception:
        return 64 * 1024 * 1024        # conservative default (v7x per-TC VMEM)


def _pick_tile_w(h, w, itemsize, cap):
    if w <= 512:
        return w                       # single full-width tile (full-dim block: no 128 rule)
    budget = max(4 << 20, cap - (16 << 20))
    # worst case ~6 (h, tw) tiles live at once (double-buffered in + out of the scale pass)
    tw = budget // max(1, 6 * h * itemsize)
    tw = max(128, min(2048, (tw // 128) * 128))
    return int(min(tw, _round_up(w, 128)))


@functools.partial(jax.jit, static_argnames=("n_iters", "eps"))
def _spectral_norm_resident(weight_mat, u, v, *, n_iters, eps):
    h, w = weight_mat.shape
    cap = _vmem_capacity_bytes()
    w_bytes = h * w * weight_mat.dtype.itemsize
    # Conservative: W_in (+ aliased W_out if Mosaic does not collapse them) + vectors + headroom,
    # clamped to this generation's physical per-core VMEM (64 MiB v7x, 128 MiB v5e/v6e).
    vmem_limit = int(min(max(2 * w_bytes + (4 << 20), 32 << 20), cap - (2 << 20)))

    vspec = pl.BlockSpec(memory_space=pltpu.MemorySpace.VMEM)   # whole array, single-buffered
    kernel = functools.partial(_spectral_norm_resident_kernel,
                               n_iters=int(n_iters), eps=float(eps))
    w_out, u_out, v_out = pl.pallas_call(
        kernel,
        in_specs=[vspec, vspec, vspec],
        out_specs=(vspec, vspec, vspec),
        out_shape=(
            jax.ShapeDtypeStruct((h, w), weight_mat.dtype),
            jax.ShapeDtypeStruct((1, h), jnp.float32),
            jax.ShapeDtypeStruct((1, w), jnp.float32),
        ),
        input_output_aliases={0: 0, 1: 1, 2: 2},
        compiler_params=pltpu.CompilerParams(vmem_limit_bytes=vmem_limit),
    )(weight_mat,
      u.astype(jnp.float32).reshape(1, h),
      v.astype(jnp.float32).reshape(1, w))
    return w_out, u_out[0], v_out[0]


@functools.partial(jax.jit, static_argnames=("n_iters", "eps", "tile_w"))
def _spectral_norm_streaming(weight_mat, u, v, *, n_iters, eps, tile_w):
    """Tiled fallback for weights above the VMEM residency ceiling (W never padded on host)."""
    h, w = weight_mat.shape
    wdt = weight_mat.dtype
    num_wt = pl.cdiv(w, tile_w)
    w_pad = num_wt * tile_w

    u = u.astype(jnp.float32).reshape(1, h)
    v = v.astype(jnp.float32).reshape(1, w)

    wv_call = pl.pallas_call(
        functools.partial(_wv_accum_kernel, w_cols=w, tile_w=tile_w),
        grid=(num_wt,),
        in_specs=[pl.BlockSpec((h, tile_w), lambda j: (0, j)),
                  pl.BlockSpec((1, tile_w), lambda j: (0, j))],
        out_specs=pl.BlockSpec((1, h), lambda j: (0, 0)),        # resident accumulator
        out_shape=jax.ShapeDtypeStruct((1, h), jnp.float32),
        compiler_params=pltpu.CompilerParams(dimension_semantics=("arbitrary",)),
    )

    wtu_call = pl.pallas_call(
        _wtu_kernel,
        grid=(num_wt,),
        in_specs=[pl.BlockSpec((h, tile_w), lambda j: (0, j)),
                  pl.BlockSpec((1, h), lambda j: (0, 0))],
        out_specs=pl.BlockSpec((1, tile_w), lambda j: (0, j)),
        out_shape=jax.ShapeDtypeStruct((1, w_pad), jnp.float32),
        compiler_params=pltpu.CompilerParams(dimension_semantics=("parallel",)),
    )

    scale_call = pl.pallas_call(
        _scale_kernel,
        grid=(num_wt,),
        in_specs=[pl.BlockSpec((1, 1), lambda j: (0, 0)),
                  pl.BlockSpec((h, tile_w), lambda j: (0, j))],
        out_specs=pl.BlockSpec((h, tile_w), lambda j: (0, j)),
        out_shape=jax.ShapeDtypeStruct((h, w), wdt),
        compiler_params=pltpu.CompilerParams(dimension_semantics=("parallel",)),
    )

    def _pad_lane(x):
        return x if w_pad == w else jnp.pad(x, ((0, 0), (0, w_pad - w)))

    def _normalize_row(x):
        return x / jnp.maximum(jnp.linalg.norm(x), eps)

    if n_iters == 0:
        sigma = jnp.sum(u * wv_call(weight_mat, _pad_lane(v)))
    else:
        wtu = jnp.zeros_like(v)
        for _ in range(int(n_iters)):                             # small static unroll (1 or 15)
            u = _normalize_row(wv_call(weight_mat, _pad_lane(v)))
            wtu = wtu_call(weight_mat, u)[:, :w]
            v = _normalize_row(wtu)
        sigma = jnp.sum(v * wtu)                                  # == u . (W v)

    inv_sigma = (1.0 / sigma).astype(jnp.float32).reshape(1, 1)
    w_scaled = scale_call(inv_sigma, weight_mat)
    return w_scaled, u[0], v[0]


def spectral_norm_pallas(weight_mat, u, v, n_iters, eps=1e-12, *,
                         force_streaming=False, tile_w=None):
    """Returns (weight_mat / sigma, u_new (h,), v_new (w,))."""
    h, w = weight_mat.shape
    cap = _vmem_capacity_bytes()
    w_bytes = h * w * weight_mat.dtype.itemsize
    resident_ok = (2 * w_bytes + (4 << 20)) <= (cap - (8 << 20))
    if resident_ok and not force_streaming:
        return _spectral_norm_resident(weight_mat, u, v,
                                       n_iters=int(n_iters), eps=float(eps))
    if tile_w is None:
        tile_w = _pick_tile_w(h, w, weight_mat.dtype.itemsize, cap)
    return _spectral_norm_streaming(weight_mat, u, v, n_iters=int(n_iters),
                                    eps=float(eps), tile_w=int(tile_w))


@functools.partial(jax.jit, static_argnames=("eps",))
def normalize_1d_pallas(x, eps=1e-12):
    n = x.shape[0]
    vspec = pl.BlockSpec(memory_space=pltpu.MemorySpace.VMEM)
    out = pl.pallas_call(
        functools.partial(_normalize_1d_kernel, eps=float(eps)),
        in_specs=[vspec],
        out_specs=vspec,
        out_shape=jax.ShapeDtypeStruct((1, n), x.dtype),
    )(x.reshape(1, n))
    return out.reshape(n)


# ----------------------------------------------------------------------------
# Module-equivalent wrapper (mirrors torch _SpectralNorm)
# ----------------------------------------------------------------------------
class SpectralNorm:
    def __init__(self, weight, key, n_power_iterations=1, eps=1e-12):
        self.eps = eps
        if weight.ndim > 1:
            self.n_power_iterations = n_power_iterations
            weight_mat = weight.reshape(weight.shape[0], -1)
            h, w = weight_mat.shape
            ku, kv = jax.random.split(key)
            u0 = jax.random.normal(ku, (h,), jnp.float32)
            v0 = jax.random.normal(kv, (w,), jnp.float32)
            u0 = u0 / jnp.maximum(jnp.linalg.norm(u0), eps)
            v0 = v0 / jnp.maximum(jnp.linalg.norm(v0), eps)
            # __init__ runs 15 power iterations (fori_loop path inside the kernel).
            _, u1, v1 = spectral_norm_pallas(weight_mat, u0, v0, 15, eps)
            self._u = u1
            self._v = v1

    def forward(self, weight, training=True):
        if weight.ndim == 1:
            return normalize_1d_pallas(weight, eps=self.eps)
        weight_mat = weight.reshape(weight.shape[0], -1)
        n_iters = self.n_power_iterations if training else 0
        w_scaled, u_new, v_new = spectral_norm_pallas(
            weight_mat, self._u, self._v, n_iters, self.eps)
        if training:  # eval mode must not touch the buffers (matches torch)
            self._u = u_new
            self._v = v_new
        return w_scaled.reshape(weight.shape)


# ----------------------------------------------------------------------------
# Pure-JAX reference (sanity check only)
# ----------------------------------------------------------------------------
def _ref_forward(weight, u, v, n_iters, eps):
    W = weight.reshape(weight.shape[0], -1).astype(jnp.float32)
    for _ in range(n_iters):
        Wv = W @ v
        u = Wv / jnp.maximum(jnp.linalg.norm(Wv), eps)
        WTu = W.T @ u
        v = WTu / jnp.maximum(jnp.linalg.norm(WTu), eps)
    sigma = jnp.dot(u, W @ v)
    return weight / sigma, u, v


if __name__ == "__main__":
    key = jax.random.PRNGKey(0)
    k_w, k_uv = jax.random.split(key)

    # Conv-style weight: [C_out=8, C_in=4, kH=3, kW=3] (OIHW, matching PyTorch)
    weight = jax.random.normal(k_w, (8, 4, 3, 3), jnp.float32)

    sn = SpectralNorm(weight, k_uv, n_power_iterations=1, eps=1e-12)
    u_before, v_before = sn._u, sn._v

    # training forward (1 power iteration) -- VMEM-resident path
    out = jax.block_until_ready(sn.forward(weight, training=True))
    ref_out, _, _ = _ref_forward(weight, u_before, v_before, 1, 1e-12)
    np.testing.assert_allclose(np.asarray(out), np.asarray(ref_out), rtol=1e-5, atol=1e-5)

    # eval forward (0 power iterations, buffers untouched)
    out_eval = jax.block_until_ready(sn.forward(weight, training=False))
    ref_eval, _, _ = _ref_forward(weight, sn._u, sn._v, 0, 1e-12)
    np.testing.assert_allclose(np.asarray(out_eval), np.asarray(ref_eval), rtol=1e-5, atol=1e-5)

    # 1-D branch
    bias = jax.random.normal(jax.random.PRNGKey(1), (8,), jnp.float32)
    bias_n = jax.block_until_ready(normalize_1d_pallas(bias))
    np.testing.assert_allclose(
        np.asarray(bias_n),
        np.asarray(bias / jnp.maximum(jnp.linalg.norm(bias), 1e-12)),
        rtol=1e-5, atol=1e-5)

    # Tiled streaming fallback (forced; would trigger automatically above the residency ceiling).
    # w=300 with tile_w=128 exercises multi-tile accumulation + ragged last lane tile.
    k1, k2, k3 = jax.random.split(jax.random.PRNGKey(2), 3)
    wm_big = jax.random.normal(k1, (16, 300), jnp.float32)
    u0 = jax.random.normal(k2, (16,), jnp.float32)
    v0 = jax.random.normal(k3, (300,), jnp.float32)
    u0 = u0 / jnp.maximum(jnp.linalg.norm(u0), 1e-12)
    v0 = v0 / jnp.maximum(jnp.linalg.norm(v0), 1e-12)
    ws, us, vs = spectral_norm_pallas(wm_big, u0, v0, 2, 1e-12,
                                      force_streaming=True, tile_w=128)
    ws = jax.block_until_ready(ws)
    ref_ws, ref_us, _ = _ref_forward(wm_big, u0, v0, 2, 1e-12)
    np.testing.assert_allclose(np.asarray(ws), np.asarray(ref_ws), rtol=1e-4, atol=1e-4)
    np.testing.assert_allclose(np.asarray(us), np.asarray(ref_us), rtol=1e-4, atol=1e-4)

    print("KERNEL_OK")
</pallas_src>

<mosaic_0001>
module attributes {stable_mosaic.version = 11 : i64} {
  func.func @_spectral_norm_resident_kernel(%arg0: memref<8x36xf32, #tpu.memory_space<vmem>>, %arg1: memref<1x8xf32, #tpu.memory_space<vmem>>, %arg2: memref<1x36xf32, #tpu.memory_space<vmem>>, %arg3: memref<8x36xf32, #tpu.memory_space<vmem>>, %arg4: memref<1x8xf32, #tpu.memory_space<vmem>>, %arg5: memref<1x36xf32, #tpu.memory_space<vmem>>) attributes {dimension_semantics = [], scalar_prefetch = 0 : i64, scratch_operands = 0 : i64, tpu.core_type = #tpu.core_type<tc>} {
    %c0 = arith.constant 0 : index
    %c0_0 = arith.constant 0 : index
    %0 = vector.load %arg1[%c0, %c0_0] : memref<1x8xf32, #tpu.memory_space<vmem>>, vector<1x8xf32>
    %c0_1 = arith.constant 0 : index
    %c0_2 = arith.constant 0 : index
    %1 = vector.load %arg2[%c0_1, %c0_2] : memref<1x36xf32, #tpu.memory_space<vmem>>, vector<1x36xf32>
    %cst = arith.constant 0.000000e+00 : f32
    %2 = vector.broadcast %cst : f32 to vector<1x36xf32>
    %c0_i32 = arith.constant 0 : i32
    %c15_i32 = arith.constant 15 : i32
    %3 = arith.addi %c0_i32, %c15_i32 : i32
    %c1_i32 = arith.constant 1 : i32
    %4:3 = scf.for %arg6 = %c0_i32 to %3 step %c1_i32 iter_args(%arg7 = %0, %arg8 = %1, %arg9 = %2) -> (vector<1x8xf32>, vector<1x36xf32>, vector<1x36xf32>)  : i32 {
      %c0_13 = arith.constant 0 : index
      %c0_14 = arith.constant 0 : index
      %17 = vector.load %arg0[%c0_13, %c0_14] : memref<8x36xf32, #tpu.memory_space<vmem>>, vector<8x36xf32>
      %cst_15 = arith.constant dense<0.000000e+00> : vector<1x8xf32>
      %18 = tpu.matmul %arg8, %17, %cst_15 {dimension_numbers = #tpu.dot_dimension_numbers<[1], [1], [0], [0], [0, 0, 1, 0], [], []>} : vector<1x36xf32>, vector<8x36xf32>, vector<1x8xf32> -> vector<1x8xf32>
      %19 = arith.mulf %18, %18 : vector<1x8xf32>
      %20 = vector.shape_cast %19 : vector<1x8xf32> to vector<1x1x8xf32>
      %cst_16 = arith.constant dense<0.000000e+00> : vector<1xf32>
      %21 = vector.multi_reduction <add>, %20, %cst_16 [1, 2] : vector<1x1x8xf32> to vector<1xf32>
      %22 = vector.shape_cast %21 : vector<1xf32> to vector<1x1x1xf32>
      %23 = vector.extract %22[0, 0, 0] : f32 from vector<1x1x1xf32>
      %cst_17 = arith.constant 1.000000e-24 : f32
      %24 = arith.cmpf oge, %23, %cst_17 : f32
      %25 = math.rsqrt %23 : f32
      %cst_18 = arith.constant 9.99999995E+11 : f32
      %26 = arith.select %24, %25, %cst_18 : f32
      %27 = vector.broadcast %26 : f32 to vector<1x8xf32>
      %28 = arith.mulf %18, %27 : vector<1x8xf32>
      %c0_19 = arith.constant 0 : index
      %c0_20 = arith.constant 0 : index
      %29 = vector.load %arg0[%c0_19, %c0_20] : memref<8x36xf32, #tpu.memory_space<vmem>>, vector<8x36xf32>
      %cst_21 = arith.constant dense<0.000000e+00> : vector<1x36xf32>
      %30 = tpu.matmul %28, %29, %cst_21 {dimension_numbers = #tpu.dot_dimension_numbers<[1], [0], [0], [1], [0, 0, 1, 1], [], []>} : vector<1x8xf32>, vector<8x36xf32>, vector<1x36xf32> -> vector<1x36xf32>
      %31 = arith.mulf %30, %30 : vector<1x36xf32>
      %32 = vector.shape_cast %31 : vector<1x36xf32> to vector<1x1x36xf32>
      %cst_22 = arith.constant dense<0.000000e+00> : vector<1xf32>
      %33 = vector.multi_reduction <add>, %32, %cst_22 [1, 2] : vector<1x1x36xf32> to vector<1xf32>
      %34 = vector.shape_cast %33 : vector<1xf32> to vector<1x1x1xf32>
      %35 = vector.extract %34[0, 0, 0] : f32 from vector<1x1x1xf32>
      %cst_23 = arith.constant 1.000000e-24 : f32
      %36 = arith.cmpf oge, %35, %cst_23 : f32
      %37 = math.rsqrt %35 : f32
      %cst_24 = arith.constant 9.99999995E+11 : f32
      %38 = arith.select %36, %37, %cst_24 : f32
      %39 = vector.broadcast %38 : f32 to vector<1x36xf32>
      %40 = arith.mulf %30, %39 : vector<1x36xf32>
      scf.yield %28, %40, %30 : vector<1x8xf32>, vector<1x36xf32>, vector<1x36xf32>
    }
    %5 = arith.mulf %4#1, %4#2 : vector<1x36xf32>
    %6 = vector.shape_cast %5 : vector<1x36xf32> to vector<1x1x36xf32>
    %cst_3 = arith.constant dense<0.000000e+00> : vector<1xf32>
    %7 = vector.multi_reduction <add>, %6, %cst_3 [1, 2] : vector<1x1x36xf32> to vector<1xf32>
    %8 = vector.shape_cast %7 : vector<1xf32> to vector<1x1x1xf32>
    %9 = vector.extract %8[0, 0, 0] : f32 from vector<1x1x1xf32>
    %cst_4 = arith.constant 1.000000e+00 : f32
    %10 = arith.divf %cst_4, %9 : f32
    %c0_5 = arith.constant 0 : index
    %c0_6 = arith.constant 0 : index
    %11 = vector.load %arg0[%c0_5, %c0_6] : memref<8x36xf32, #tpu.memory_space<vmem>>, vector<8x36xf32>
    %12 = vector.broadcast %10 : f32 to vector<8x36xf32>
    %13 = arith.mulf %11, %12 : vector<8x36xf32>
    %c0_7 = arith.constant 0 : index
    %c0_8 = arith.constant 0 : index
    %14 = vector.load %arg3[%c0_7, %c0_8] : memref<8x36xf32, #tpu.memory_space<vmem>>, vector<8x36xf32>
    tpu.vector_store %arg3[%c0_7, %c0_8], %13 {strides = array<i32>} : memref<8x36xf32, #tpu.memory_space<vmem>>, vector<8x36xf32>,
    %c0_9 = arith.constant 0 : index
    %c0_10 = arith.constant 0 : index
    %15 = vector.load %arg4[%c0_9, %c0_10] : memref<1x8xf32, #tpu.memory_space<vmem>>, vector<1x8xf32>
    tpu.vector_store %arg4[%c0_9, %c0_10], %4#0 {strides = array<i32>} : memref<1x8xf32, #tpu.memory_space<vmem>>, vector<1x8xf32>,
    %c0_11 = arith.constant 0 : index
    %c0_12 = arith.constant 0 : index
    %16 = vector.load %arg5[%c0_11, %c0_12] : memref<1x36xf32, #tpu.memory_space<vmem>>, vector<1x36xf32>
    tpu.vector_store %arg5[%c0_11, %c0_12], %4#1 {strides = array<i32>} : memref<1x36xf32, #tpu.memory_space<vmem>>, vector<1x36xf32>,
    return
  }
}

</mosaic_0001>

<bundles_post_ra>
// kernel: _spectral_norm_resident.1
= control target key start
LH: loop header
LB: loop body
LE: loop exit
PB: predicated region body
PF: predicated region fallthrough
CT: control target
= control target key end

     0   :  { %s373_s20 = smov 0   ;;  %s407_s0 = inlined_call_operand.vmem [shape: f32[8,36], index: 0, kind: input, shape index: {}, may-alias: {0,3}]   ;;  %s408_s1 = inlined_call_operand.vmem [shape: f32[1,8], index: 1, kind: input, shape index: {}, may-alias: {1,4}]   ;;  %s409_s2 = inlined_call_operand.vmem [shape: f32[1,36], index: 2, kind: input, shape index: {}, may-alias: {2,5}]   ;;  %s410_s3 = inlined_call_operand.vmem [shape: f32[8,36], index: 3, kind: output, shape index: {0}, may-alias: {0,3}]   ;;  %s411_s4 = inlined_call_operand.vmem [shape: f32[1,8], index: 4, kind: output, shape index: {1}, may-alias: {1,4}]   ;;  %s412_s5 = inlined_call_operand.vmem [shape: f32[1,36], index: 5, kind: output, shape index: {2}, may-alias: {2,5}]  }
   0x1   :  { %v18_v0 = vld [vmem:[%s409_s2] sm:$0x1]  }
   0x2 LB: > { %v28_v1 = vld [vmem:[%s407_s0] sm:$0xff]  ;;  %vm29_vm0 = vcmask 293888   ;;  %v336_v2 = vmov 0.0   ;;  %vm337_vm1 = vmmov 0   ;;  %vm107_vm2 = vcmask 57344   ;;  %s24_s20 = sadd.s32 1, %s334_s20   ;;  %s334_s20 = sphi %s373_s20, %s24_s20   ;;  %v330_v0 = vphi %v18_v0, %v413_v0  }
   0x3   : > { %274 = vmatprep.subr.mxu0 %v336_v2  ;;  %276 = vmatprep.mubr.msk.f32.mxu0 %vm337_vm1, %v336_v2  ;;  %vm125_vm3 = vcmask 64512   ;;  %vm200_vm4 = vcmask 286720   ;;  %p21_p2 = scmp.ge.s32.totalorder %s24_s20, 15  }
   0x4   : > { %275 = vmatpush3.xpose.msk.msra.mxu0 %vm29_vm0, %v28_v1  ;;  %279 = vmatprep.subr.mxu1 %v336_v2  ;;  %v233_v44 = vld [vmem:[%s407_s0] sm:$0xff] (%p21_p2) }
   0x5   : > { %280 = vmatpush3.msra.mxu1 %v28_v1  ;;  %281 = vmatprep.mubr.msk.f32.mxu1 %vm337_vm1, %v336_v2 }
   0x7   : > { %277 = vmatmul.mubr.msk.f32.vlgmr.msra.gmra.mrb[0].mxu0 %vm29_vm0, %v330_v0 }
  0xda   : > { %v102_v3 = vpop.f32.mrb[0].mxu0 }
  0xdb   : > { %v278_v4 = vpop.f32.mrb[1].mxu0  ;;  %v106_v5 = vmul.f32 %v102_v3, %v102_v3 }
  0xdd   : > { %v108_v6 = vsel %vm107_vm2, %v106_v5, 0.0 }
  0xde   : > { %109 = vadd.xlane.f32.xlu0 %v108_v6 }
 0x16b   : > { %v110_v7 = vpop.xlane.xlu0 %109 }
 0x16c   : > { %v111_v8 = vrot.slane %v110_v7, 4 }
 0x16e   : > { %v112_v9 = vadd.f32 %v111_v8, %v110_v7 }
 0x170   : > { %v113_v10 = vrot.slane %v112_v9, 2 }
 0x172   : > { %v114_v11 = vadd.f32 %v113_v10, %v112_v9 }
 0x174   : > { %v115_v12 = vrot.slane %v114_v11, 1 }
 0x176   : > { %v116_v13 = vadd.f32 %v115_v12, %v114_v11 }
 0x178   : > { %284 = vpush %v116_v13 }
 0x1a9   : > { %s285_s2 = spop %284 }
 0x1aa   : > { %v119_v14 = vstv %s285_s2  ;;  %p118_p0 = scmp.ge.f32.partialorder %s285_s2, 1e-24 }
 0x1ab   : > { %314 = vrsqrt.f32 %v119_v14 }
 0x1b5   : > { %v315_v15 = vpop.eup %314 }
 0x1b6   : > { %286 = vpush %v315_v15 }
 0x1e7   : > { %s287_s22 = spop %286 }
 0x1e8   : > { %s415_s22 = smov (!%p118_p0, %s287_s22), 1e+12 }
 0x1e9   : > { %v123_v16 = vstv %s415_s22 }
 0x1ea   : > { %v124_v17 = vmul.f32 %v123_v16, %v102_v3 }
 0x1ec   : > { %282 = vmatmul.mubr.msk.f32.vlgmr.msra.gmra.mrb[0].mxu1 %vm125_vm3, %v124_v17  ;;  %239 = vst.msk [vmem:[%s411_s4] sm:$0x1] (%p21_p2), %vm107_vm2, %v124_v17 }
 0x2bf   : > { %v195_v18 = vpop.f32.mrb[0].mxu1 }
 0x2c0   : > { %v199_v19 = vmul.f32 %v195_v18, %v195_v18  ;;  %v283_v20 = vpop.f32.mrb[1].mxu1 }
 0x2c2   : > { %v201_v21 = vsel %vm200_vm4, %v199_v19, 0.0 }
 0x2c3   : > { %202 = vadd.xlane.f32.xlu0 %v201_v21 }
 0x350   : > { %v203_v22 = vpop.xlane.xlu0 %202 }
 0x351   : > { %v204_v23 = vrot.slane %v203_v22, 4 }
 0x353   : > { %v205_v24 = vadd.f32 %v204_v23, %v203_v22 }
 0x355   : > { %v206_v25 = vrot.slane %v205_v24, 2 }
 0x357   : > { %v207_v26 = vadd.f32 %v206_v25, %v205_v24 }
 0x359   : > { %v208_v27 = vrot.slane %v207_v26, 1 }
 0x35b   : > { %v209_v28 = vadd.f32 %v208_v27, %v207_v26 }
 0x35d   : > { %288 = vpush %v209_v28 }
 0x38e   : > { %s289_s23 = spop %288 }
 0x38f   : > { %v212_v29 = vstv %s289_s23  ;;  %p211_p1 = scmp.ge.f32.partialorder %s289_s23, 1e-24 }
 0x390   : > { %316 = vrsqrt.f32 %v212_v29 }
 0x39a   : > { %v317_v30 = vpop.eup %316 }
 0x39b   : > { %290 = vpush %v317_v30 }
 0x3cb   :  { %23 = sbr.rel (!%p21_p2) target bundleno = 2 (0x2), region = 55 }
 0x3cc   : > { %s291_s24 = spop %290 }
 0x3cd   : > { %s417_s24 = smov (!%p211_p1, %s291_s24), 1e+12 }
 0x3ce   : > { %v216_v31 = vstv %s417_s24 }
 0x3cf   : > { %v217_v32 = vmul.f32 %v216_v31, %v195_v18  }
 0x3d1   : > { %v413_v0 = vmov %v217_v32  ;;  %v218_v33 = vmul.f32 (%p21_p2), %v217_v32, %v195_v18  ;;  %240 = vst.msk [vmem:[%s412_s5] sm:$0x1] (%p21_p2), %vm200_vm4, %v217_v32 }
 0x3d3   :  { %v220_v34 = vsel %vm200_vm4, %v218_v33, 0.0 }
 0x3d4   :  { %221 = vadd.xlane.f32.xlu0 %v220_v34 }
 0x461   :  { %v222_v35 = vpop.xlane.xlu0 %221 }
 0x462   :  { %v223_v36 = vrot.slane %v222_v35, 4 }
 0x464   :  { %v224_v37 = vadd.f32 %v223_v36, %v222_v35 }
 0x466   :  { %v225_v38 = vrot.slane %v224_v37, 2 }
 0x468   :  { %v226_v39 = vadd.f32 %v225_v38, %v224_v37 }
 0x46a   :  { %v227_v40 = vrot.slane %v226_v39, 1 }
 0x46c   :  { %v228_v41 = vadd.f32 %v227_v40, %v226_v39 }
 0x46e   :  { %292 = vpush %v228_v41 }
 0x49f   :  { %s293_s29 = spop %292 }
 0x4a0   :  { %v230_v42 = vstv %s293_s29 }
 0x4a1   :  { %318 = vrcp.f32 %v230_v42 }
 0x4ab   :  { %v319_v43 = vpop.eup %318 }
 0x4ac   :  { %294 = vpush %v319_v43 }
 0x4dd   :  { %s295_s5 = spop %294 }
 0x4de   :  { %v234_v45 = vstv %s295_s5 }
 0x4df   :  { %v235_v46 = vmul.f32 %v234_v45, %v233_v44 }
 0x4e1   :  { %237 = vst.msk [vmem:[%s410_s3] sm:$0xff] %vm29_vm0, %v235_v46 }

</bundles_post_ra>
